<compile_context>
chip_gen: v7x
topology: tpu7x:2x2x1
jax: 0.10.0
libtpu: 0.0.40
codegen_flags: <defaults>
</compile_context>

<pallas_src>
import functools

import numpy as np

import jax
import jax.numpy as jnp
from jax import lax
from jax.experimental import pallas as pl
from jax.experimental.pallas import tpu as pltpu


_MIN_LANES = 128   # pad the flat spatial axis of tiny branches up to one vreg row
_N_LEVELS = 4
_N_BLOCKS = 4


# -----------------------------------------------------------------------------------
# pltpu.roll direction probe (shift-sign convention verified once against np.roll
# with a one-line kernel before the main kernels are traced).
# -----------------------------------------------------------------------------------
@functools.lru_cache(maxsize=None)
def _roll_matches_np() -> bool:
    x = np.arange(8 * 128, dtype=np.float32).reshape(8, 128)

    def k(x_ref, o_ref):
        o_ref[...] = pltpu.roll(x_ref[...], 3, axis=1)

    y = np.asarray(
        pl.pallas_call(k, out_shape=jax.ShapeDtypeStruct((8, 128), jnp.float32))(
            jnp.asarray(x)))
    if np.array_equal(y, np.roll(x, 3, axis=1)):
        return True
    if np.array_equal(y, np.roll(x, -3, axis=1)):
        return False
    raise RuntimeError("unexpected pltpu.roll semantics")


def _shift_lanes(x, off):
    """y[:, m] = x[:, (m + off) mod M].  Out-of-image taps are zeroed by the caller's
    mask, so wrapped-around values never leak into valid outputs."""
    if off == 0:
        return x
    m = x.shape[1]
    sgn = 1 if _roll_matches_np() else -1
    return pltpu.roll(x, (-sgn * off) % m, axis=1)


# -----------------------------------------------------------------------------------
# In-kernel building blocks (flat lane-dense layout: (C, Mp), m = n*H*W + h*W + w)
# -----------------------------------------------------------------------------------
def _conv3x3_flat(x, get_w, mask, width, bias=None, relu=False):
    """3x3, stride-1, pad-1 conv on the flat layout via 9 accumulating MXU dots.

    x     : (Cin, Mp) f32 activation.
    get_w : get_w(t) -> (Cout, Cin) bf16 weight for tap t = (dh+1)*3 + (dw+1).
    mask  : (9, Mp) f32 validity mask (image borders + lane padding).
    width : true row width W of this resolution level.
    """
    acc = None
    t = 0
    for dh in (-1, 0, 1):
        for dw in (-1, 0, 1):
            off = dh * width + dw
            tap = (_shift_lanes(x, off) * mask[t:t + 1, :]).astype(jnp.bfloat16)
            p = jnp.dot(get_w(t), tap, preferred_element_type=jnp.float32)
            acc = p if acc is None else acc + p
            t += 1
    if bias is not None:
        acc = acc + bias
    if relu:
        acc = jnp.maximum(acc, 0.0)
    return acc


@functools.lru_cache(maxsize=None)
def _branch_blocks_call(channels, m_pad, width, n_blocks):
    """One pallas_call running n_blocks BasicBlocks for one branch, fully in VMEM."""

    def kernel(x_ref, w_ref, b_ref, mask_ref, o_ref):
        mask = mask_ref[...]
        x = x_ref[...]
        for blk in range(n_blocks):
            ident = x
            h = _conv3x3_flat(x, lambda t, k=2 * blk: w_ref[k, t], mask, width,
                              bias=b_ref[2 * blk], relu=True)
            h = _conv3x3_flat(h, lambda t, k=2 * blk + 1: w_ref[k, t], mask, width,
                              bias=b_ref[2 * blk + 1], relu=False)
            x = jnp.maximum(h + ident, 0.0)
        o_ref[...] = x

    return pl.pallas_call(
        kernel, out_shape=jax.ShapeDtypeStruct((channels, m_pad), jnp.float32))


@functools.lru_cache(maxsize=None)
def _exchange_row_call(i, chans, m_pads, widths):
    """One pallas_call computing exchange output branch i:
    relu(x_i + sum_{j<i} relu(downchain(x_j)) + sum_{j>i} relu(conv1x1(upsample(x_j))))."""
    levels = len(chans)

    def kernel(*refs):
        o_ref = refs[-1]
        it = iter(refs[:-1])
        xs = [next(it) for _ in range(levels)]
        masks = [next(it)[...] for _ in range(i)]      # levels 0..i-1
        subs = [next(it)[...] for _ in range(i)]       # subsample level l -> l+1

        acc = xs[i][...]                               # identity term (f32)

        # Down paths: chains of stride-2 3x3 convs (BN+ReLU only on the last conv).
        # Stride-2 conv == stride-1 conv followed by exact 0/1-matrix subsampling.
        for j in range(i):
            h = xs[j][...]
            for k in range(i - j):
                lvl = j + k
                w_ref = next(it)
                y = _conv3x3_flat(h, lambda t, r=w_ref: r[t], masks[lvl], widths[lvl])
                h = jnp.dot(y, subs[lvl], preferred_element_type=jnp.float32)
            b = next(it)[...]
            acc = acc + jnp.maximum(h + b, 0.0)

        # Up paths: bilinear upsample (align_corners=True) as an interpolation-matrix
        # matmul, then 1x1 conv + BN bias + ReLU (PyTorch op order preserved).
        for j in range(i + 1, levels):
            ut = next(it)[...]
            w = next(it)[...]
            b = next(it)[...]
            xi = jnp.dot(xs[j][...], ut, preferred_element_type=jnp.float32)
            term = jnp.dot(w, xi.astype(jnp.bfloat16),
                           preferred_element_type=jnp.float32) + b
            acc = acc + jnp.maximum(term, 0.0)

        o_ref[...] = jnp.maximum(acc, 0.0)             # branch-final ReLU

    return pl.pallas_call(
        kernel, out_shape=jax.ShapeDtypeStruct((chans[i], m_pads[i]), jnp.float32))


def _exchange_row_args(i, xs, row_params, aux):
    levels = len(xs)
    args = list(xs)
    args += [aux["mask"][l] for l in range(i)]
    args += [aux["st"][l] for l in range(i)]
    for j in range(i):
        args += list(row_params[j]["ws"])
        args.append(row_params[j]["b"])
    for j in range(i + 1, levels):
        args.append(aux["ut"][(i, j)])
        args.append(row_params[j]["w"])
        args.append(row_params[j]["b"])
    return args


# -----------------------------------------------------------------------------------
# Layout glue (runs once per forward, outside the kernels)
# -----------------------------------------------------------------------------------
def _to_flat(x, m_pad):
    n, c, h, w = x.shape
    xf = jnp.transpose(x, (1, 0, 2, 3)).reshape(c, n * h * w)
    pad = m_pad - n * h * w
    if pad:
        xf = jnp.pad(xf, ((0, 0), (0, pad)))
    return xf


def _from_flat(xf, n, c, h, w):
    return jnp.transpose(xf[:, : n * h * w].reshape(c, n, h, w), (1, 0, 2, 3))


@jax.jit
def fourth_stage_forward(params, aux, xs_nchw):
    levels = len(xs_nchw)
    shapes = [x.shape for x in xs_nchw]                   # (N, C, H, W) per level
    m_pads = tuple(max(n * h * w, _MIN_LANES) for (n, _, h, w) in shapes)
    chans = tuple(s[1] for s in shapes)
    widths = tuple(s[3] for s in shapes)

    xs = [_to_flat(xs_nchw[l], m_pads[l]) for l in range(levels)]
    for g, e in (("groupconv1", "exchange1"),
                 ("groupconv2", "exchange2"),
                 ("groupconv3", "exchange3")):
        xs = [
            _branch_blocks_call(chans[l], m_pads[l], widths[l], _N_BLOCKS)(
                xs[l], params[g][l]["w"], params[g][l]["b"], aux["mask"][l])
            for l in range(levels)
        ]
        xs = [
            _exchange_row_call(i, chans, m_pads, widths)(
                *_exchange_row_args(i, xs, params[e][i], aux))
            for i in range(levels)
        ]
    return [_from_flat(xs[l], *shapes[l]) for l in range(levels)]


# -----------------------------------------------------------------------------------
# Host-side constant builders: masks, subsample matrices, bilinear interp matrices
# -----------------------------------------------------------------------------------
def _np_masks(n, h, w, m_pad):
    base = np.zeros((9, h * w), np.float32)
    t = 0
    for dh in (-1, 0, 1):
        for dw in (-1, 0, 1):
            for hh in range(h):
                for ww in range(w):
                    ok = (0 <= hh + dh < h) and (0 <= ww + dw < w)
                    base[t, hh * w + ww] = 1.0 if ok else 0.0
            t += 1
    out = np.zeros((9, m_pad), np.float32)
    out[:, : n * h * w] = np.tile(base, (1, n))
    return out


def _np_subsample_T(n, h, w, m_pad_in, m_pad_out):
    ho, wo = h // 2, w // 2
    st = np.zeros((m_pad_in, m_pad_out), np.float32)
    for nn in range(n):
        for oh in range(ho):
            for ow in range(wo):
                st[nn * h * w + 2 * oh * w + 2 * ow, nn * ho * wo + oh * wo + ow] = 1.0
    return st


def _np_interp_mat(dst, src):
    a = np.zeros((dst, src), np.float32)
    if dst == 1:
        a[0, 0] = 1.0
        return a
    pos = np.arange(dst, dtype=np.float64) * ((src - 1) / (dst - 1))
    lo = np.clip(np.floor(pos).astype(np.int64), 0, src - 1)
    hi = np.minimum(lo + 1, src - 1)
    frac = (pos - lo).astype(np.float32)
    for d in range(dst):
        a[d, lo[d]] += 1.0 - frac[d]
        a[d, hi[d]] += frac[d]
    return a


def _np_upsample_T(n, hs, ws, hd, wd, m_pad_src, m_pad_dst):
    ah = _np_interp_mat(hd, hs)
    aw = _np_interp_mat(wd, ws)
    u = np.kron(np.eye(n, dtype=np.float32), np.kron(ah, aw))   # (n*hd*wd, n*hs*ws)
    ut = np.zeros((m_pad_src, m_pad_dst), np.float32)
    ut[: n * hs * ws, : n * hd * wd] = u.T
    return ut


def build_aux(n, h0, w0, levels=_N_LEVELS):
    lv = []
    for l in range(levels):
        hl, wl = h0 // (2 ** l), w0 // (2 ** l)
        ml = n * hl * wl
        lv.append((hl, wl, ml, max(ml, _MIN_LANES)))
    masks = [jnp.asarray(_np_masks(n, hl, wl, mp)) for (hl, wl, _, mp) in lv]
    sts = [jnp.asarray(_np_subsample_T(n, lv[l][0], lv[l][1], lv[l][3], lv[l + 1][3]))
           for l in range(levels - 1)]
    uts = {}
    for i in range(levels):
        for j in range(i + 1, levels):
            uts[(i, j)] = jnp.asarray(
                _np_upsample_T(n, lv[j][0], lv[j][1], lv[i][0], lv[i][1],
                               lv[j][3], lv[i][3]))
    return {"mask": masks, "st": sts, "ut": uts}


# -----------------------------------------------------------------------------------
# Deterministic synthetic parameters (BN folded into weights / bias, weights in bf16)
# -----------------------------------------------------------------------------------
class KeyGen:
    def __init__(self, key):
        self._key, self._n = key, 0

    def __call__(self):
        self._n += 1
        return jax.random.fold_in(self._key, self._n)


def _he_conv3x3(key, cin, cout):
    std = (2.0 / (9 * cin)) ** 0.5
    return std * jax.random.normal(key, (9, cout, cin), jnp.float32)


def _he_conv1x1(key, cin, cout):
    std = (2.0 / cin) ** 0.5
    return std * jax.random.normal(key, (cout, cin), jnp.float32)


def _bn_fold(key, cout):
    kg, kb = jax.random.split(key)
    gamma = 0.5 + 0.05 * jax.random.normal(kg, (cout,), jnp.float32)
    beta = 0.1 * jax.random.normal(kb, (cout,), jnp.float32)
    scale = gamma / jnp.sqrt(1.0 + 1e-5)   # eval-mode BN: running stats (0, 1)
    return scale, beta


def _init_branch_blocks(kg, channels, n_blocks=_N_BLOCKS):
    ws, bs = [], []
    for _ in range(n_blocks):
        for _ in range(2):
            w = _he_conv3x3(kg(), channels, channels)
            s, b = _bn_fold(kg(), channels)
            ws.append((w * s[None, :, None]).astype(jnp.bfloat16))
            bs.append(b.reshape(channels, 1))
    return {"w": jnp.stack(ws), "b": jnp.stack(bs)}


def _init_exchange(kg, base_c, levels=_N_LEVELS):
    rows = []
    for i in range(levels):
        row = []
        for j in range(levels):
            if j < i:
                ws, b_last = [], None
                cur = (2 ** j) * base_c
                for k in range(i - j):
                    nxt = (2 ** (j + k + 1)) * base_c
                    w = _he_conv3x3(kg(), cur, nxt)
                    if k == i - j - 1:                       # last conv: BN + ReLU
                        s, b = _bn_fold(kg(), nxt)
                        w = w * s[None, :, None]
                        b_last = b.reshape(nxt, 1)
                    ws.append(w.astype(jnp.bfloat16))
                    cur = nxt
                row.append({"ws": ws, "b": b_last})
            elif j > i:
                cin, cout = (2 ** j) * base_c, (2 ** i) * base_c
                w = _he_conv1x1(kg(), cin, cout)
                s, b = _bn_fold(kg(), cout)
                row.append({"w": (w * s[:, None]).astype(jnp.bfloat16),
                            "b": b.reshape(cout, 1)})
            else:
                row.append(None)
        rows.append(row)
    return rows


def init_fourth_stage(kg, base_c):
    def group():
        return [_init_branch_blocks(kg, (2 ** i) * base_c) for i in range(_N_LEVELS)]

    return {
        "groupconv1": group(), "exchange1": _init_exchange(kg, base_c),
        "groupconv2": group(), "exchange2": _init_exchange(kg, base_c),
        "groupconv3": group(), "exchange3": _init_exchange(kg, base_c),
    }


# -----------------------------------------------------------------------------------
# Plain-XLA reference (PyTorch operation order) used to validate the fused kernels
# -----------------------------------------------------------------------------------
def _ref_conv3x3(x, w, stride):
    k9, cout, cin = w.shape
    w4 = jnp.transpose(w, (1, 2, 0)).reshape(cout, cin, 3, 3)
    return lax.conv_general_dilated(
        x.astype(jnp.bfloat16), w4.astype(jnp.bfloat16),
        window_strides=(stride, stride), padding=((1, 1), (1, 1)),
        dimension_numbers=("NCHW", "OIHW", "NCHW"),
        preferred_element_type=jnp.float32)


def _ref_conv1x1(x, w):
    cout, cin = w.shape
    return lax.conv_general_dilated(
        x.astype(jnp.bfloat16), w.reshape(cout, cin, 1, 1).astype(jnp.bfloat16),
        window_strides=(1, 1), padding=((0, 0), (0, 0)),
        dimension_numbers=("NCHW", "OIHW", "NCHW"),
        preferred_element_type=jnp.float32)


def _ref_interp(x, ht, wt):
    n, c, h, w = x.shape
    if (h, w) == (ht, wt):
        return x

    def grid(src, dst):
        pos = jnp.arange(dst, dtype=jnp.float32) * ((src - 1) / max(dst - 1, 1))
        lo = jnp.clip(jnp.floor(pos).astype(jnp.int32), 0, src - 1)
        hi = jnp.minimum(lo + 1, src - 1)
        return lo, hi, pos - lo.astype(jnp.float32)

    hl, hh, hf = grid(h, ht)
    wl, wh, wf = grid(w, wt)
    xh = (x[:, :, hl, :] * (1.0 - hf)[None, None, :, None]
          + x[:, :, hh, :] * hf[None, None, :, None])
    return (xh[:, :, :, wl] * (1.0 - wf)[None, None, None, :]
            + xh[:, :, :, wh] * wf[None, None, None, :])


def _ref_basic_blocks(x, w, b):
    n_blocks = w.shape[0] // 2
    for k in range(n_blocks):
        ident = x
        h = jax.nn.relu(_ref_conv3x3(x, w[2 * k], 1) + b[2 * k].reshape(1, -1, 1, 1))
        h = _ref_conv3x3(h, w[2 * k + 1], 1) + b[2 * k + 1].reshape(1, -1, 1, 1)
        x = jax.nn.relu(h + ident)
    return x


def _ref_exchange(rowps, xs):
    levels = len(xs)
    out = [x for x in xs]
    for i in range(levels):
        for j in range(levels):
            if j < i:
                chain = rowps[i][j]
                h = xs[j]
                n = len(chain["ws"])
                for k in range(n):
                    h = _ref_conv3x3(h, chain["ws"][k], 2)
                    if k == n - 1:
                        h = jax.nn.relu(h + chain["b"].reshape(1, -1, 1, 1))
                out[i] = out[i] + h
            elif j > i:
                cp = rowps[i][j]
                xi = _ref_interp(xs[j], out[i].shape[2], out[i].shape[3])
                t = _ref_conv1x1(xi, cp["w"]) + cp["b"].reshape(1, -1, 1, 1)
                out[i] = out[i] + jax.nn.relu(t)
    return [jax.nn.relu(o) for o in out]


@jax.jit
def reference_forward(params, xs_nchw):
    xs = list(xs_nchw)
    for g, e in (("groupconv1", "exchange1"),
                 ("groupconv2", "exchange2"),
                 ("groupconv3", "exchange3")):
        xs = [_ref_basic_blocks(xs[l], params[g][l]["w"], params[g][l]["b"])
              for l in range(len(xs))]
        xs = _ref_exchange(params[e], xs)
    return xs


# -----------------------------------------------------------------------------------
if __name__ == "__main__":
    C, N, H, W = 4, 2, 16, 16
    root = jax.random.PRNGKey(0)
    kin, kparam = jax.random.split(root)

    xs_nchw = []
    for i in range(_N_LEVELS):
        kin, sub = jax.random.split(kin)
        xs_nchw.append(jax.random.normal(
            sub, (N, (2 ** i) * C, H // (2 ** i), W // (2 ** i)), jnp.float32))

    params = init_fourth_stage(KeyGen(kparam), C)
    aux = build_aux(N, H, W)

    _roll_matches_np()  # resolve the hardware roll convention before tracing

    outs = fourth_stage_forward(params, aux, xs_nchw)
    outs = [jax.block_until_ready(o) for o in outs]

    refs = reference_forward(params, xs_nchw)
    refs = [np.asarray(jax.block_until_ready(r)) for r in refs]

    for o, r, x in zip(outs, refs, xs_nchw):
        assert o.shape == x.shape and o.dtype == x.dtype
        o_np = np.asarray(o)
        assert np.all(np.isfinite(o_np))
        assert np.all(o_np >= 0.0)          # every branch ends with a ReLU
        np.testing.assert_allclose(o_np, r, rtol=5e-2, atol=5e-2)

    print("KERNEL_OK")
</pallas_src>

<mosaic_0001>
module attributes {stable_mosaic.version = 11 : i64} {
  func.func @k(%arg0: memref<8x128xf32, #tpu.memory_space<vmem>>, %arg1: memref<8x128xf32, #tpu.memory_space<vmem>>) attributes {dimension_semantics = [], scalar_prefetch = 0 : i64, scratch_operands = 0 : i64, tpu.core_type = #tpu.core_type<tc>} {
    %c0 = arith.constant 0 : index
    %c0_0 = arith.constant 0 : index
    %0 = vector.load %arg0[%c0, %c0_0] : memref<8x128xf32, #tpu.memory_space<vmem>>, vector<8x128xf32>
    %c3_i32 = arith.constant 3 : i32
    %1 = tpu.dynamic_rotate %0 by %c3_i32 dim 1 : vector<8x128xf32>, i32 -> vector<8x128xf32>
    %c0_1 = arith.constant 0 : index
    %c0_2 = arith.constant 0 : index
    %2 = vector.load %arg1[%c0_1, %c0_2] : memref<8x128xf32, #tpu.memory_space<vmem>>, vector<8x128xf32>
    tpu.vector_store %arg1[%c0_1, %c0_2], %1 {strides = array<i32>} : memref<8x128xf32, #tpu.memory_space<vmem>>, vector<8x128xf32>,
    return
  }
}

</mosaic_0001>

<bundles_post_ra>
// kernel: tpu_custom_call.1
= control target key start
LH: loop header
LB: loop body
LE: loop exit
PB: predicated region body
PF: predicated region fallthrough
CT: control target
= control target key end

     0   :  { %6 = vsyncpa [#allocation3], 0  ;;  %s128_s0 = inlined_call_operand.hbm [shape: f32[8,128], index: 0, kind: input, shape index: {}]   ;;  %s129_s1 = inlined_call_operand.hbm [shape: f32[8,128], index: 1, kind: output, shape index: {}]  }
   0x1   :  { %7 = vsyncpa [#allocation4], 0  ;;  %s91_s6 = smov [#allocation2]   ;;  %s43_s10 = scalar_lea.hbm %s128_s0, 128 }
   0x2   :  { %s14_s7 = sshll.u32 %s91_s6, 4  ;;  %p44_p0 = scmp.ne.s32.totalorder %s128_s0, %s43_s10  ;;  %s15_s7 = int_to_ptr.vmem [resolvable:$true] %s14_s7 }
   0x3   :  { %p47_p1 = scmp.lt.u32.totalorder %s43_s10, %s128_s0 }
   0x5   :  { %p49_p2 = pnand %p47_p1, %p44_p0 }
   0x7   :  { %52 = shalt.err (!%p49_p2)
}
   0x8   :  { %s53_s15 = scalar_lea.vmem %s15_s7, 128  ;;  %p58_p4 = scmp.lt.s32.totalorder %s15_s7, %s15_s7 }
   0x9   :  { %p54_p3 = scmp.ne.s32.totalorder %s15_s7, %s53_s15  ;;  %p59_p5 = scmp.lt.s32.totalorder %s53_s15, %s53_s15 }
   0xb   :  { %p60_p6 = por %p59_p5, %p58_p4 }
   0xd   :  { %p61_p7 = pnand %p60_p6, %p54_p3 }
   0xf   :  { %64 = shalt.err (!%p61_p7)
}
  0x10   :  { %17 = dma.hbm_to_vmem [thread:$0]  %s128_s0, 128, %s15_s7, [#allocation3]  }
  0x11   :  { %87 = dma.done.wait [#allocation3], 128  }
  0x12   :  { %88 = vsyncadd [#allocation3], 4294967168  ;;  %v21_v0 = vld [vmem:[#allocation2] sm:$0xff]  ;;  %s92_s18 = smov 3   ;;  %s93_s19 = smov [#allocation5]  }
  0x13   :  { %22 = vrot.lane.b32.xlu0 %v21_v0, %s92_s18  ;;  %s31_s20 = sshll.u32 %s93_s19, 4  ;;  %s32_s20 = int_to_ptr.vmem [resolvable:$true] %s31_s20 }
  0x14   :  { %s65_s21 = scalar_lea.vmem %s32_s20, 128  ;;  %p70_p9 = scmp.lt.s32.totalorder %s32_s20, %s32_s20 }
  0x15   :  { %p66_p8 = scmp.ne.s32.totalorder %s32_s20, %s65_s21  ;;  %p71_p10 = scmp.lt.s32.totalorder %s65_s21, %s65_s21 }
  0x17   :  { %p72_p11 = por %p71_p10, %p70_p9 }
  0x19   :  { %p73_p12 = pnand %p72_p11, %p66_p8 }
  0x85   :  { %v23_v1 = vpop.permute.xlu0 %22 }
  0x86   :  { %24 = vst [vmem:[#allocation5] sm:$0xff] %v23_v1 }
  0x87   :  { %76 = shalt.err (!%p73_p12)
}
  0x88   :  { %s77_s0 = scalar_lea.hbm %s129_s1, 128 }
  0x89   :  { %p78_p13 = scmp.ne.s32.totalorder %s129_s1, %s77_s0  ;;  %p81_p0 = scmp.lt.u32.totalorder %s77_s0, %s129_s1 }
  0x8b   :  { %p83_p1 = pnand %p81_p0, %p78_p13 }
  0x8d   :  { %86 = shalt.err (!%p83_p1)
}
  0x8e   :  { %34 = dma.vmem_to_hbm [thread:$0]  %s32_s20, 128, %s129_s1, [#allocation4]  }
  0x8f   :  { %89 = dma.done.wait [#allocation4], 128  }
  0x90   :  { %90 = vsyncadd [#allocation4], 4294967168 }
  0x91   :  { %38 = vsyncpa [#allocation3], 1 }
  0x92   :  { %39 = vsyncpa [#allocation4], 1 }

</bundles_post_ra>
